<compile_context>
chip_gen: v7x
topology: tpu7x:2x2x1
jax: 0.10.0
libtpu: 0.0.40
codegen_flags: <defaults>
</compile_context>

<pallas_src>
import jax
import jax.numpy as jnp
from jax.experimental import pallas as pl
from jax.experimental.pallas import tpu as pltpu

_LANES = 128
_SUBLANES = 8
_PAD_QUANTUM = _SUBLANES * _LANES  # 1024 elements

# Scoped-VMEM limit: > default 16 MiB (v5e) / 32 MiB (v6e, v7x) so double
# buffering survives, < v7x's 64 MiB physical VMEM.
_VMEM_LIMIT_BYTES = 48 << 20


def _tile_cap_bytes() -> int:
    """Per-tile byte cap: ~8 MiB on v7x (3.2 TB/s HBM), ~4 MiB on v5e/v6e."""
    try:
        kind = jax.devices()[0].device_kind.lower()
    except Exception:
        kind = ""
    return (8 << 20) if "v7" in kind else (4 << 20)


def _copy_kernel(w_ref, o_ref):
    # Pure pass-through of the synthesized-image parameter tile.
    o_ref[...] = w_ref[...]


def _choose_row_tile(rows: int, row_bytes: int, cap_bytes: int) -> int:
    """Largest multiple of 8 rows under the byte cap; for large slabs also cap
    so the grid has >= ~8 steps (v7x megacore balance + pipeline depth)."""
    cap_rows = max(_SUBLANES, cap_bytes // row_bytes)
    if rows >= 8 * _SUBLANES:
        cap_rows = min(cap_rows, pl.cdiv(rows, 8))
    tile = min(rows, cap_rows)
    tile -= tile % _SUBLANES
    return max(tile, _SUBLANES)


def _tiled_copy(w2d: jax.Array, rows: int, donate: bool) -> jax.Array:
    itemsize = jnp.dtype(w2d.dtype).itemsize
    tile = _choose_row_tile(rows, _LANES * itemsize, _tile_cap_bytes())
    grid = (pl.cdiv(rows, tile),)  # ragged last block handled by Pallas
    kwargs = {}
    if donate:
        kwargs["input_output_aliases"] = {0: 0}
    return pl.pallas_call(
        _copy_kernel,
        out_shape=jax.ShapeDtypeStruct((rows, _LANES), w2d.dtype),
        grid=grid,
        in_specs=[pl.BlockSpec((tile, _LANES), lambda i: (i, 0))],
        out_specs=pl.BlockSpec((tile, _LANES), lambda i: (i, 0)),
        compiler_params=pltpu.CompilerParams(
            dimension_semantics=("parallel",),
            vmem_limit_bytes=_VMEM_LIMIT_BYTES,
        ),
        **kwargs,
    )(w2d)


def synthesized_image_forward(
    weight: jax.Array, *, materialize: bool = False, donate: bool = False
) -> jax.Array:
    """Forward pass of SynthesizedImage: returns the stored image parameter.

    materialize=False (default): identity — no kernel, no HBM traffic.
    materialize=True: produce a fresh copy via the Pallas tiled-copy kernel.
    donate=True: hint XLA that the (reshaped) input buffer may be reused for
    the output (only pass when the caller actually donates the parameter).
    """
    if not materialize:
        # forward() is an identity; doing nothing beats any kernel.
        return weight

    orig_shape = weight.shape
    total = weight.size

    if total % _LANES == 0 and (total // _LANES) >= _SUBLANES:
        # Lane-dense path: (rows, 128) slab, large row tiles, 1-D parallel grid.
        rows = total // _LANES
        out2d = _tiled_copy(weight.reshape(rows, _LANES), rows, donate)
        return out2d.reshape(orig_shape)

    # Odd / tiny sizes: pad the flat image up to a multiple of 8*128 in the
    # wrapper, run the same lane-dense tiled copy, then slice back.
    pad = (-total) % _PAD_QUANTUM
    flat = jnp.pad(weight.reshape(-1), (0, pad))
    rows = flat.size // _LANES
    out2d = _tiled_copy(flat.reshape(rows, _LANES), rows, donate=False)
    return out2d.reshape(-1)[:total].reshape(orig_shape)


if __name__ == "__main__":
    # Deterministic "parameter" init (stands in for torch.rand(*img_shape)).
    img_shape = (2, 4, 16, 16)  # (N, C, H, W)
    key = jax.random.PRNGKey(0)
    weight = jax.random.uniform(key, img_shape, dtype=jnp.float32)

    # 1) Default fast path: identity, no kernel launched.
    out_fast = jax.block_until_ready(synthesized_image_forward(weight))
    assert out_fast.shape == img_shape and out_fast.dtype == weight.dtype
    assert bool(jnp.all(out_fast == weight))

    # 2) Materialized copy through the Pallas lane-dense tiled kernel.
    out_copy = jax.block_until_ready(
        synthesized_image_forward(weight, materialize=True)
    )
    assert out_copy.shape == img_shape and out_copy.dtype == weight.dtype
    assert bool(jnp.all(out_copy == weight))

    # 3) Odd-sized image exercises the padded (still tiled) fallback path.
    odd_shape = (1, 3, 5, 7)
    odd_w = jax.random.uniform(jax.random.PRNGKey(0), odd_shape, dtype=jnp.float32)
    out_odd = jax.block_until_ready(
        synthesized_image_forward(odd_w, materialize=True)
    )
    assert out_odd.shape == odd_shape and out_odd.dtype == odd_w.dtype
    assert bool(jnp.all(out_odd == odd_w))

    print("KERNEL_OK")
</pallas_src>

<mosaic_0001>
module attributes {stable_mosaic.version = 11 : i64} {
  func.func @_copy_kernel(%arg0: i32, %arg1: memref<16x128xf32, #tpu.memory_space<vmem>>, %arg2: memref<16x128xf32, #tpu.memory_space<vmem>>) attributes {dimension_semantics = [#tpu.dimension_semantics<parallel>], iteration_bounds = array<i64: 1>, scalar_prefetch = 0 : i64, scratch_operands = 0 : i64, tpu.core_type = #tpu.core_type<tc>, window_params = [{transform_indices = @transform_0, window_bounds = array<i64: 16, 128>}, {transform_indices = @transform_1, window_bounds = array<i64: 16, 128>}]} {
    %c0 = arith.constant 0 : index
    %c0_0 = arith.constant 0 : index
    %0 = vector.load %arg1[%c0, %c0_0] : memref<16x128xf32, #tpu.memory_space<vmem>>, vector<16x128xf32>
    %c0_1 = arith.constant 0 : index
    %c0_2 = arith.constant 0 : index
    %1 = vector.load %arg2[%c0_1, %c0_2] : memref<16x128xf32, #tpu.memory_space<vmem>>, vector<16x128xf32>
    tpu.vector_store %arg2[%c0_1, %c0_2], %0 {strides = array<i32>} : memref<16x128xf32, #tpu.memory_space<vmem>>, vector<16x128xf32>,
    return
  }
  func.func @transform_0(%arg0: i32) -> (i32, i32) {
    %c0_i32 = arith.constant 0 : i32
    %c0_i32_0 = arith.constant 0 : i32
    return %arg0, %c0_i32 : i32, i32
  }
  func.func @transform_1(%arg0: i32) -> (i32, i32) {
    %c0_i32 = arith.constant 0 : i32
    %c0_i32_0 = arith.constant 0 : i32
    return %arg0, %c0_i32 : i32, i32
  }
}

</mosaic_0001>

<bundles_post_ra>
// kernel: tpu_custom_call.1
= control target key start
LH: loop header
LB: loop body
LE: loop exit
PB: predicated region body
PF: predicated region fallthrough
CT: control target
= control target key end

     0   :  { %6 = vsyncpa [#allocation3], 0  ;;  %s134_s0 = inlined_call_operand.hbm [shape: f32[16,128], index: 0, kind: input, shape index: {}]   ;;  %s135_s1 = inlined_call_operand.hbm [shape: f32[16,128], index: 1, kind: output, shape index: {}]  }
   0x1   :  { %7 = vsyncpa [#allocation4], 0  ;;  %s96_s6 = smov [#allocation2]   ;;  %s48_s10 = scalar_lea.hbm %s134_s0, 256 }
   0x2   :  { %s13_s7 = sshll.u32 %s96_s6, 4  ;;  %p49_p0 = scmp.ne.s32.totalorder %s134_s0, %s48_s10  ;;  %s14_s7 = int_to_ptr.vmem [resolvable:$true] %s13_s7 }
   0x3   :  { %p52_p1 = scmp.lt.u32.totalorder %s48_s10, %s134_s0 }
   0x5   :  { %p54_p2 = pnand %p52_p1, %p49_p0 }
   0x7   :  { %57 = shalt.err (!%p54_p2)
}
   0x8   :  { %s58_s15 = scalar_lea.vmem %s14_s7, 256  ;;  %p63_p4 = scmp.lt.s32.totalorder %s14_s7, %s14_s7 }
   0x9   :  { %p59_p3 = scmp.ne.s32.totalorder %s14_s7, %s58_s15  ;;  %p64_p5 = scmp.lt.s32.totalorder %s58_s15, %s58_s15 }
   0xb   :  { %p65_p6 = por %p64_p5, %p63_p4 }
   0xd   :  { %p66_p7 = pnand %p65_p6, %p59_p3 }
   0xf   :  { %69 = shalt.err (!%p66_p7)
}
  0x10   :  { %s97_s16 = smov 128   ;;  %s98_s17 = smov 8  }
  0x11   :  { %19 = dma.hbm_to_vmem [thread:$0]  %s134_s0, 256, %s14_s7, [#allocation3], %s97_s16, %s97_s16, %s98_s17  }
  0x12   :  { %92 = dma.done.wait [#allocation3], 256  }
  0x13   :  { %93 = vsyncadd [#allocation3], 4294967040  ;;  %s99_s20 = smov [#allocation5]   ;;  %v23_v0 = vld [vmem:[#allocation2] sm:$0xff]  ;;  %v24_v1 = vld [vmem:[#allocation2 + $0x8] sm:$0xff] }
  0x14   :  { %s32_s21 = sshll.u32 %s99_s20, 4  ;;  %25 = vst [vmem:[#allocation5] sm:$0xff] %v23_v0  ;;  %26 = vst [vmem:[#allocation5 + $0x8] sm:$0xff] %v24_v1  ;;  %s33_s21 = int_to_ptr.vmem [resolvable:$true] %s32_s21 }
  0x15   :  { %s70_s22 = scalar_lea.vmem %s33_s21, 256  ;;  %p75_p9 = scmp.lt.s32.totalorder %s33_s21, %s33_s21 }
  0x16   :  { %p71_p8 = scmp.ne.s32.totalorder %s33_s21, %s70_s22  ;;  %p76_p10 = scmp.lt.s32.totalorder %s70_s22, %s70_s22 }
  0x18   :  { %p77_p11 = por %p76_p10, %p75_p9 }
  0x1a   :  { %p78_p12 = pnand %p77_p11, %p71_p8 }
  0x1c   :  { %81 = shalt.err (!%p78_p12)
}
  0x1d   :  { %s82_s0 = scalar_lea.hbm %s135_s1, 256 }
  0x1e   :  { %p83_p13 = scmp.ne.s32.totalorder %s135_s1, %s82_s0  ;;  %p86_p0 = scmp.lt.u32.totalorder %s82_s0, %s135_s1 }
  0x20   :  { %p88_p1 = pnand %p86_p0, %p83_p13 }
  0x22   :  { %91 = shalt.err (!%p88_p1)
}
  0x23   :  { %38 = dma.vmem_to_hbm [thread:$0]  %s33_s21, 256, %s135_s1, [#allocation4], %s97_s16, %s97_s16, %s98_s17  }
  0x24   :  { %94 = dma.done.wait [#allocation4], 256  }
  0x25   :  { %95 = vsyncadd [#allocation4], 4294967040 }
  0x26   :  { %42 = vsyncpa [#allocation3], 1 }
  0x27   :  { %43 = vsyncpa [#allocation4], 1 }

</bundles_post_ra>
